<compile_context>
chip_gen: v7x
topology: tpu7x:2x2x1
jax: 0.10.0
libtpu: 0.0.40
codegen_flags: <defaults>
</compile_context>

<pallas_src>
import functools

import jax
import jax.numpy as jnp
from jax.experimental import pallas as pl
from jax.experimental.pallas import tpu as pltpu


def _round_up(x, m):
    return (x + m - 1) // m * m


def _vmem_estimate(tb, Hp, tk):
    """Double-buffered working-set estimate in bytes."""
    x_b = tb * Hp * 2 * 2          # bf16 x tile, double-buffered
    w1_b = Hp * tk * 2 * 2         # bf16 w1 tile
    w2_b = tk * Hp * 2 * 2         # bf16 w2 tile
    b2_b = Hp * 4 * 2              # f32 fused bias
    out_b = tb * Hp * 4 * 2        # f32 output tile
    acc_b = tb * Hp * 4            # f32 accumulator scratch
    return x_b + w1_b + w2_b + b2_b + out_b + acc_b


# Conservative budget: leaves headroom on v7x (64 MiB physical VMEM) while
# still allowing tb up to 512 on v5e/v6e for realistic hidden sizes.
_VMEM_BUDGET = 40 * (1 << 20)


def _pick_tiles(B, Hp, H4p):
    b_cap = _round_up(B, 16)                     # multiple of 16 for bf16 packing
    for tb_cand in (512, 384, 256, 128, 64, 32, 16):
        tb = min(tb_cand, b_cap)
        for tk in (512, 256, 128):
            if H4p % tk:
                continue
            if _vmem_estimate(tb, Hp, tk) <= _VMEM_BUDGET:
                return tb, tk
    # Fallback for extreme shapes (would want the h_cache variant instead).
    return min(16, b_cap), 128


def _mlp_kernel(x_ref, w1_ref, w2_ref, b2_ref, o_ref, acc_ref, *, world_size):
    k = pl.program_id(1)

    @pl.when(k == 0)
    def _init():
        acc_ref[...] = jnp.zeros_like(acc_ref)

    # fc1 slab: (tb, Hp) @ (Hp, tk) -> (tb, tk).  bf16 operands, f32 accumulate.
    # Computed exactly once per (batch tile, k) -- no output-axis recompute.
    h = jnp.dot(x_ref[...], w1_ref[...], preferred_element_type=jnp.float32)
    h = h.astype(jnp.bfloat16)                   # back to bf16 for the second MXU pass

    # fc2 partial accumulation: (tb, tk) @ (tk, Hp) -> (tb, Hp), f32 accumulator.
    acc_ref[...] += jnp.dot(h, w2_ref[...], preferred_element_type=jnp.float32)

    @pl.when(k == pl.num_programs(1) - 1)
    def _finalize():
        # Fused epilogue in f32: folded bias (b1 @ W2 + b2) + simulated
        # all_reduce(sum) over `world_size` bit-identical replicas.
        y = (acc_ref[...] + b2_ref[...]) * jnp.float32(world_size)
        o_ref[...] = y.astype(o_ref.dtype)


def prepare_mlp_params(w1_t, b1, w2_t, b2):
    """One-time weight prep (hoisted out of the per-call hot path).

    w1_t: (H, 4H), b1: (4H,), w2_t: (4H, H), b2: (H,).
    Returns (w1p, w2p, b2p) padded/cast for the kernel.
    """
    H, H4 = w1_t.shape
    Hp = _round_up(H, 128)
    H4p = _round_up(H4, 128)

    w1b = w1_t.astype(jnp.bfloat16)
    w2b = w2_t.astype(jnp.bfloat16)
    if (Hp, H4p) == (H, H4):
        w1p, w2p = w1b, w2b                      # already tile-aligned: no copy
    else:
        w1p = jnp.zeros((Hp, H4p), jnp.bfloat16).at[:H, :H4].set(w1b)
        w2p = jnp.zeros((H4p, Hp), jnp.bfloat16).at[:H4, :H].set(w2b)

    # Fold b1 into the fc2 bias in full f32:  y = (x@W1)@W2 + (b1@W2 + b2).
    b2_eff = (b1.astype(jnp.float32) @ w2_t.astype(jnp.float32)
              + b2.astype(jnp.float32))
    b2p = jnp.zeros((1, Hp), jnp.float32).at[:, :H].set(b2_eff[None, :])
    return w1p, w2p, b2p


def mlp_forward(x, w1p, w2p, b2p, *, world_size):
    """x: (B, H) f32; w1p: (Hp, H4p) bf16; w2p: (H4p, Hp) bf16; b2p: (1, Hp) f32."""
    B, H = x.shape
    Hp, H4p = w1p.shape

    tb, tk = _pick_tiles(B, Hp, H4p)
    Bp = _round_up(B, tb)

    # v7x megacore: when the whole batch fits in one tile but the tile is
    # large, split it so both TensorCores get a parallel grid step.
    if Bp // tb == 1 and tb >= 256:
        tb //= 2

    # Activation pad/cast (only per-call data-dependent work).
    if (Bp, Hp) == (B, H):
        xp = x.astype(jnp.bfloat16)
    else:
        xp = jnp.zeros((Bp, Hp), jnp.bfloat16).at[:B, :H].set(
            x.astype(jnp.bfloat16))

    n_b = Bp // tb
    n_k = H4p // tk
    grid = (n_b, n_k)

    # FLOPs: fc1 + fc2, each computed exactly once.
    flops = 2 * Bp * Hp * H4p + 2 * Bp * H4p * Hp
    # Actual streamed HBM bytes: x + out once; weights once per batch tile.
    bytes_accessed = (xp.size * 2
                      + n_b * (w1p.size * 2 + w2p.size * 2 + b2p.size * 4)
                      + Bp * Hp * 4)

    vmem_needed = _vmem_estimate(tb, Hp, tk)
    vmem_limit = int(min(max(vmem_needed + (4 << 20), 32 << 20), 56 << 20))

    kernel = functools.partial(_mlp_kernel, world_size=world_size)
    out_p = pl.pallas_call(
        kernel,
        out_shape=jax.ShapeDtypeStruct((Bp, Hp), jnp.float32),
        grid_spec=pltpu.PrefetchScalarGridSpec(
            num_scalar_prefetch=0,
            grid=grid,
            in_specs=[
                # x tile: full (padded) H contraction, batch-tiled.
                pl.BlockSpec((tb, Hp), lambda i, k: (i, 0)),
                # w1 tile: (Hp, tk) streamed over the 4H axis, once per batch tile.
                pl.BlockSpec((Hp, tk), lambda i, k: (0, k)),
                # w2 tile: (tk, Hp) streamed over the 4H axis, once per batch tile.
                pl.BlockSpec((tk, Hp), lambda i, k: (k, 0)),
                # fused bias (b1 @ W2 + b2): one lane-dense row.
                pl.BlockSpec((1, Hp), lambda i, k: (0, 0)),
            ],
            out_specs=pl.BlockSpec((tb, Hp), lambda i, k: (i, 0)),
            scratch_shapes=[pltpu.VMEM((tb, Hp), jnp.float32)],
        ),
        compiler_params=pltpu.CompilerParams(
            dimension_semantics=("parallel", "arbitrary"),
            vmem_limit_bytes=vmem_limit),
        cost_estimate=pl.CostEstimate(
            flops=int(flops), transcendentals=0,
            bytes_accessed=int(bytes_accessed)),
    )(xp, w1p, w2p, b2p)

    return out_p[:B, :H]


def _init_linear(key, in_features, out_features):
    """Deterministic torch.nn.Linear-style init: U(-1/sqrt(fan_in), +1/sqrt(fan_in))."""
    kw, kb = jax.random.split(key)
    bound = 1.0 / jnp.sqrt(jnp.float32(in_features))
    # stored transposed: (in_features, out_features)
    w_t = jax.random.uniform(kw, (in_features, out_features), jnp.float32,
                             minval=-bound, maxval=bound)
    b = jax.random.uniform(kb, (out_features,), jnp.float32,
                           minval=-bound, maxval=bound)
    return w_t, b


if __name__ == "__main__":
    hidden_dim = 32
    batch = 8
    world_size = 4

    root = jax.random.PRNGKey(0)
    kx, k1, k2 = jax.random.split(root, 3)

    x = jax.random.normal(kx, (batch, hidden_dim), jnp.float32)
    w1_t, b1 = _init_linear(k1, hidden_dim, hidden_dim * 4)   # fc1
    w2_t, b2 = _init_linear(k2, hidden_dim * 4, hidden_dim)   # fc2

    # One-time weight prep (outside the hot path).
    w1p, w2p, b2p = prepare_mlp_params(w1_t, b1, w2_t, b2)

    out = mlp_forward(x, w1p, w2p, b2p, world_size=world_size)
    out = jax.block_until_ready(out)
    assert out.shape == (batch, hidden_dim)

    # Reference that mirrors kernel numerics (bf16 operands, f32 accumulation,
    # b1 folded into the f32 epilogue bias).
    xb = x.astype(jnp.bfloat16)
    w1b = w1_t.astype(jnp.bfloat16)
    w2b = w2_t.astype(jnp.bfloat16)
    h_ref = jnp.dot(xb, w1b, preferred_element_type=jnp.float32)
    ref_bf16 = (jnp.dot(h_ref.astype(jnp.bfloat16), w2b,
                        preferred_element_type=jnp.float32)
                + (b1 @ w2_t + b2)) * world_size
    assert jnp.allclose(out, ref_bf16, rtol=3e-3, atol=3e-3), \
        "mismatch vs bf16-accurate reference"

    # Loose sanity check against the pure-f32 math of the torch module.
    ref_f32 = ((x @ w1_t + b1) @ w2_t + b2) * world_size
    assert jnp.allclose(out, ref_f32, rtol=5e-2, atol=5e-2), \
        "mismatch vs f32 reference"

    print("KERNEL_OK")
</pallas_src>

<mosaic_0001>
module attributes {stable_mosaic.version = 11 : i64} {
  func.func @_mlp_kernel(%arg0: i32, %arg1: i32, %arg2: memref<16x128xbf16, #tpu.memory_space<vmem>>, %arg3: memref<128x128xbf16, #tpu.memory_space<vmem>>, %arg4: memref<128x128xbf16, #tpu.memory_space<vmem>>, %arg5: memref<1x128xf32, #tpu.memory_space<vmem>>, %arg6: memref<16x128xf32, #tpu.memory_space<vmem>>, %arg7: memref<16x128xf32, #tpu.memory_space<vmem>>) attributes {dimension_semantics = [#tpu.dimension_semantics<parallel>, #tpu.dimension_semantics<arbitrary>], iteration_bounds = array<i64: 1, 1>, scalar_prefetch = 0 : i64, scratch_operands = 1 : i64, tpu.core_type = #tpu.core_type<tc>, window_params = [{transform_indices = @transform_0, window_bounds = array<i64: 16, 128>}, {transform_indices = @transform_1, window_bounds = array<i64: 128, 128>}, {transform_indices = @transform_2, window_bounds = array<i64: 128, 128>}, {pipeline_mode = #tpu.pipeline_mode<synchronous>, transform_indices = @transform_3, window_bounds = array<i64: 1, 128>}, {transform_indices = @transform_4, window_bounds = array<i64: 16, 128>}]} {
    %c0_i32 = arith.constant 0 : i32
    %0 = arith.cmpi eq, %arg1, %c0_i32 : i32
    %1 = arith.extui %0 : i1 to i32
    %c0_i32_0 = arith.constant 0 : i32
    %2 = arith.cmpi ne, %1, %c0_i32_0 : i32
    scf.if %2 {
      %cst_13 = arith.constant 0.000000e+00 : f32
      %15 = vector.broadcast %cst_13 : f32 to vector<16x128xf32>
      %c0_14 = arith.constant 0 : index
      %c0_15 = arith.constant 0 : index
      %16 = vector.load %arg7[%c0_14, %c0_15] : memref<16x128xf32, #tpu.memory_space<vmem>>, vector<16x128xf32>
      tpu.vector_store %arg7[%c0_14, %c0_15], %15 {strides = array<i32>} : memref<16x128xf32, #tpu.memory_space<vmem>>, vector<16x128xf32>,
    } else {
    }
    %c0 = arith.constant 0 : index
    %c0_1 = arith.constant 0 : index
    %3 = vector.load %arg2[%c0, %c0_1] : memref<16x128xbf16, #tpu.memory_space<vmem>>, vector<16x128xbf16>
    %c0_2 = arith.constant 0 : index
    %c0_3 = arith.constant 0 : index
    %4 = vector.load %arg3[%c0_2, %c0_3] : memref<128x128xbf16, #tpu.memory_space<vmem>>, vector<128x128xbf16>
    %cst = arith.constant dense<0.000000e+00> : vector<16x128xf32>
    %5 = tpu.matmul %3, %4, %cst {dimension_numbers = #tpu.dot_dimension_numbers<[1], [0], [0], [1], [0, 0, 1, 1], [], []>} : vector<16x128xbf16>, vector<128x128xbf16>, vector<16x128xf32> -> vector<16x128xf32>
    %6 = arith.truncf %5 : vector<16x128xf32> to vector<16x128xbf16>
    %c0_4 = arith.constant 0 : index
    %c0_5 = arith.constant 0 : index
    %7 = vector.load %arg7[%c0_4, %c0_5] : memref<16x128xf32, #tpu.memory_space<vmem>>, vector<16x128xf32>
    %c0_6 = arith.constant 0 : index
    %c0_7 = arith.constant 0 : index
    %8 = vector.load %arg4[%c0_6, %c0_7] : memref<128x128xbf16, #tpu.memory_space<vmem>>, vector<128x128xbf16>
    %cst_8 = arith.constant dense<0.000000e+00> : vector<16x128xf32>
    %9 = tpu.matmul %6, %8, %cst_8 {dimension_numbers = #tpu.dot_dimension_numbers<[1], [0], [0], [1], [0, 0, 1, 1], [], []>} : vector<16x128xbf16>, vector<128x128xbf16>, vector<16x128xf32> -> vector<16x128xf32>
    %10 = arith.addf %7, %9 : vector<16x128xf32>
    %c0_9 = arith.constant 0 : index
    %c0_10 = arith.constant 0 : index
    %11 = vector.load %arg7[%c0_9, %c0_10] : memref<16x128xf32, #tpu.memory_space<vmem>>, vector<16x128xf32>
    tpu.vector_store %arg7[%c0_9, %c0_10], %10 {strides = array<i32>} : memref<16x128xf32, #tpu.memory_space<vmem>>, vector<16x128xf32>,
    %c0_i32_11 = arith.constant 0 : i32
    %12 = arith.cmpi eq, %arg1, %c0_i32_11 : i32
    %13 = arith.extui %12 : i1 to i32
    %c0_i32_12 = arith.constant 0 : i32
    %14 = arith.cmpi ne, %13, %c0_i32_12 : i32
    scf.if %14 {
      %c0_13 = arith.constant 0 : index
      %c0_14 = arith.constant 0 : index
      %15 = vector.load %arg7[%c0_13, %c0_14] : memref<16x128xf32, #tpu.memory_space<vmem>>, vector<16x128xf32>
      %c0_15 = arith.constant 0 : index
      %c0_16 = arith.constant 0 : index
      %16 = vector.load %arg5[%c0_15, %c0_16] : memref<1x128xf32, #tpu.memory_space<vmem>>, vector<1x128xf32>
      %17 = vector.broadcast %16 : vector<1x128xf32> to vector<16x128xf32>
      %18 = arith.addf %15, %17 : vector<16x128xf32>
      %cst_17 = arith.constant 4.000000e+00 : f32
      %19 = vector.broadcast %cst_17 : f32 to vector<16x128xf32>
      %20 = arith.mulf %18, %19 : vector<16x128xf32>
      %c0_18 = arith.constant 0 : index
      %c0_19 = arith.constant 0 : index
      %21 = vector.load %arg6[%c0_18, %c0_19] : memref<16x128xf32, #tpu.memory_space<vmem>>, vector<16x128xf32>
      tpu.vector_store %arg6[%c0_18, %c0_19], %20 {strides = array<i32>} : memref<16x128xf32, #tpu.memory_space<vmem>>, vector<16x128xf32>,
    } else {
    }
    return
  }
  func.func @transform_0(%arg0: i32, %arg1: i32) -> (i32, i32) {
    %c0_i32 = arith.constant 0 : i32
    %c0_i32_0 = arith.constant 0 : i32
    return %arg0, %c0_i32 : i32, i32
  }
  func.func @transform_1(%arg0: i32, %arg1: i32) -> (i32, i32) {
    %c0_i32 = arith.constant 0 : i32
    %c0_i32_0 = arith.constant 0 : i32
    return %c0_i32, %arg1 : i32, i32
  }
  func.func @transform_2(%arg0: i32, %arg1: i32) -> (i32, i32) {
    %c0_i32 = arith.constant 0 : i32
    %c0_i32_0 = arith.constant 0 : i32
    return %arg1, %c0_i32 : i32, i32
  }
  func.func @transform_3(%arg0: i32, %arg1: i32) -> (i32, i32) {
    %c0_i32 = arith.constant 0 : i32
    %c0_i32_0 = arith.constant 0 : i32
    %c0_i32_1 = arith.constant 0 : i32
    return %c0_i32, %c0_i32_0 : i32, i32
  }
  func.func @transform_4(%arg0: i32, %arg1: i32) -> (i32, i32) {
    %c0_i32 = arith.constant 0 : i32
    %c0_i32_0 = arith.constant 0 : i32
    return %arg0, %c0_i32 : i32, i32
  }
}

</mosaic_0001>

<bundles_post_ra>
// kernel: tpu_custom_call.1
= control target key start
LH: loop header
LB: loop body
LE: loop exit
PB: predicated region body
PF: predicated region fallthrough
CT: control target
= control target key end

     0   :  { %9 = vsyncpa [#allocation4], 0  ;;  %s626_s0 = inlined_call_operand.hbm [shape: bf16[16,128], index: 0, kind: input, shape index: {}]   ;;  %s627_s1 = inlined_call_operand.hbm [shape: bf16[128,128], index: 1, kind: input, shape index: {}]   ;;  %s628_s2 = inlined_call_operand.hbm [shape: bf16[128,128], index: 2, kind: input, shape index: {}]   ;;  %s629_s3 = inlined_call_operand.vmem [shape: f32[1,128], index: 3, kind: input, shape index: {}]   ;;  %s630_s4 = inlined_call_operand.hbm [shape: f32[16,128], index: 4, kind: output, shape index: {}]  }
   0x1   :  { %10 = vsyncpa [#allocation7], 0 }
   0x2   :  { %11 = vsyncpa [#allocation5], 0  ;;  %s524_s15 = smov [#allocation6]   ;;  %s525_s17 = smov [#allocation3]  }
   0x3   :  { %s29_s16 = sshll.u32 %s524_s15, 4  ;;  %s17_s18 = sshll.u32 %s525_s17, 4  ;;  %s30_s16 = int_to_ptr.vmem [resolvable:$true] %s29_s16  ;;  %s559_s18 = int_to_ptr.vmem [resolvable:$true] %s17_s18 }
   0x4   :  { %s430_s21 = scalar_lea.hbm %s627_s1, 1024 }
   0x5   :  { %p431_p0 = scmp.ne.s32.totalorder %s627_s1, %s430_s21  ;;  %p434_p1 = scmp.lt.u32.totalorder %s430_s21, %s627_s1 }
   0x7   :  { %p436_p2 = pnand %p434_p1, %p431_p0 }
   0x9   :  { %439 = shalt.err (!%p436_p2)
}
   0xa   :  { %s440_s26 = scalar_lea.vmem %s30_s16, 1024  ;;  %p445_p4 = scmp.lt.s32.totalorder %s30_s16, %s30_s16 }
   0xb   :  { %p441_p3 = scmp.ne.s32.totalorder %s30_s16, %s440_s26  ;;  %p446_p5 = scmp.lt.s32.totalorder %s440_s26, %s440_s26 }
   0xd   :  { %p447_p6 = por %p446_p5, %p445_p4 }
   0xf   :  { %p448_p7 = pnand %p447_p6, %p441_p3 }
  0x11   :  { %451 = shalt.err (!%p448_p7)
}
  0x12   :  { %s526_s27 = smov 64   ;;  %s527_s28 = smov 4  }
  0x13   :  { %35 = dma.hbm_to_vmem [thread:$0]  %s627_s1, 1024, %s30_s16, [#allocation7], %s526_s27, %s526_s27, %s527_s28  }
  0x14   :  { %s452_s7 = scalar_lea.hbm %s626_s0, 128 }
  0x15   :  { %p453_p8 = scmp.ne.s32.totalorder %s626_s0, %s452_s7  ;;  %p456_p9 = scmp.lt.u32.totalorder %s452_s7, %s626_s0 }
  0x17   :  { %p458_p10 = pnand %p456_p9, %p453_p8 }
  0x19   :  { %461 = shalt.err (!%p458_p10)
}
  0x1a   :  { %s462_s12 = scalar_lea.vmem %s559_s18, 128  ;;  %p467_p12 = scmp.lt.s32.totalorder %s559_s18, %s559_s18 }
  0x1b   :  { %p463_p11 = scmp.ne.s32.totalorder %s559_s18, %s462_s12  ;;  %p468_p13 = scmp.lt.s32.totalorder %s462_s12, %s462_s12 }
  0x1d   :  { %p469_p0 = por %p468_p13, %p467_p12 }
  0x1f   :  { %p470_p1 = pnand %p469_p0, %p463_p11 }
  0x21   :  { %473 = shalt.err (!%p470_p1)
}
  0x22   :  { %23 = dma.hbm_to_vmem [thread:$0]  %s626_s0, 128, %s559_s18, [#allocation4], %s526_s27, %s526_s27, %s527_s28  }
  0x23   :  { %s528_s14 = smov [#allocation8]   ;;  %s474_s19 = scalar_lea.hbm %s628_s2, 1024 }
  0x24   :  { %s41_s15 = sshll.u32 %s528_s14, 4  ;;  %p475_p2 = scmp.ne.s32.totalorder %s628_s2, %s474_s19  ;;  %s42_s15 = int_to_ptr.vmem [resolvable:$true] %s41_s15 }
  0x25   :  { %p478_p3 = scmp.lt.u32.totalorder %s474_s19, %s628_s2 }
  0x27   :  { %p480_p4 = pnand %p478_p3, %p475_p2 }
  0x29   :  { %483 = shalt.err (!%p480_p4)
}
  0x2a   :  { %s484_s24 = scalar_lea.vmem %s42_s15, 1024  ;;  %p489_p6 = scmp.lt.s32.totalorder %s42_s15, %s42_s15 }
  0x2b   :  { %p485_p5 = scmp.ne.s32.totalorder %s42_s15, %s484_s24  ;;  %p490_p7 = scmp.lt.s32.totalorder %s484_s24, %s484_s24 }
  0x2d   :  { %p491_p8 = por %p490_p7, %p489_p6 }
  0x2f   :  { %p492_p9 = pnand %p491_p8, %p485_p5 }
  0x31   :  { %495 = shalt.err (!%p492_p9)
}
  0x32   :  { %47 = dma.hbm_to_vmem [thread:$0]  %s628_s2, 1024, %s42_s15, [#allocation7], %s526_s27, %s526_s27, %s527_s28  }
  0x33   :  { %518 = dma.done.wait [#allocation4], 128  }
  0x34   :  { %519 = vsyncadd [#allocation4], 4294967168 }
  0x35   :  { %520 = dma.done.wait [#allocation7], 2048  }
  0x36   :  { %521 = vsyncadd [#allocation7], 4294965248  ;;  %v529_v0 = vmov 0.0   ;;  %vm530_vm0 = vmmov 0   ;;  %v413_v1 = vld [vmem:[#allocation6] sm:$0xff]   ;;  %v414_v2 = vld [vmem:[#allocation6 + $0x8] sm:$0xff]  }
  0x37   :  { %363 = vmatprep.subr.bf16.mxu0 %v529_v0  ;;  %379 = vmatprep.mubr.msk.bf16.mxu0 %vm530_vm0, %v529_v0  ;;  %v415_v3 = vld [vmem:[#allocation6 + $0x10] sm:$0xff]   ;;  %v422_v4 = vld [vmem:[#allocation8] sm:$0xff]   ;;  %v416_v5 = vld [vmem:[#allocation6 + $0x18] sm:$0xff]   ;;  %s531_s26 = smov [#allocation9]  }
  0x38   :  { %383 = vmatprep.subr.bf16.mxu1 %v529_v0  ;;  %399 = vmatprep.mubr.msk.bf16.mxu1 %vm530_vm0, %v529_v0  ;;  %v423_v6 = vld [vmem:[#allocation8 + $0x8] sm:$0xff]   ;;  %v417_v7 = vld [vmem:[#allocation6 + $0x20] sm:$0xff]   ;;  %v424_v8 = vld [vmem:[#allocation8 + $0x10] sm:$0xff]   ;;  %s314_s27 = sshll.u32 %s531_s26, 4  ;;  %s315_s27 = int_to_ptr.vmem [resolvable:$true] %s314_s27 }
  0x39   :  { %364 = vmatpush3.bf16.msra.mxu0 %v413_v1  ;;  %384 = vmatpush3.bf16.msra.mxu1 %v422_v4  ;;  %v418_v9 = vld [vmem:[#allocation6 + $0x28] sm:$0xff]   ;;  %v425_v10 = vld [vmem:[#allocation8 + $0x18] sm:$0xff]   ;;  %v419_v11 = vld [vmem:[#allocation6 + $0x30] sm:$0xff]   ;;  %s496_s28 = scalar_lea.vmem %s315_s27, 256  ;;  %p501_p11 = scmp.lt.s32.totalorder %s315_s27, %s315_s27 }
  0x3a   :  { %365 = vmatprep.subr.bf16.mxu0 %v529_v0  ;;  %385 = vmatprep.subr.bf16.mxu1 %v529_v0  ;;  %v426_v12 = vld [vmem:[#allocation8 + $0x20] sm:$0xff]   ;;  %v420_v13 = vld [vmem:[#allocation6 + $0x38] sm:$0xff]   ;;  %v427_v14 = vld [vmem:[#allocation8 + $0x28] sm:$0xff]   ;;  %p497_p10 = scmp.ne.s32.totalorder %s315_s27, %s496_s28  ;;  %p502_p12 = scmp.lt.s32.totalorder %s496_s28, %s496_s28 }
  0x3b   :  { %v421_v15 = vld [vmem:[#allocation3] sm:$0xff]   ;;  %v428_v16 = vld [vmem:[#allocation8 + $0x30] sm:$0xff]  }
  0x3c   :  { %v429_v17 = vld [vmem:[#allocation8 + $0x38] sm:$0xff]   ;;  %p503_p13 = por %p502_p12, %p501_p11 }
  0x3d   :  { %366 = vmatpush3.bf16.msra.mxu0 %v414_v2  ;;  %386 = vmatpush3.bf16.msra.mxu1 %v423_v6  ;;  %v344_v23 = vld [vmem:[%s629_s3] ss:$0 sm:$0xff] }
  0x3e   :  { %367 = vmatprep.subr.bf16.mxu0 %v529_v0  ;;  %387 = vmatprep.subr.bf16.mxu1 %v529_v0  ;;  %p504_p0 = pnand %p503_p13, %p497_p10 }
  0x41   :  { %368 = vmatpush3.bf16.msra.mxu0 %v415_v3  ;;  %388 = vmatpush3.bf16.msra.mxu1 %v424_v8 }
  0x42   :  { %369 = vmatprep.subr.bf16.mxu0 %v529_v0  ;;  %389 = vmatprep.subr.bf16.mxu1 %v529_v0 }
  0x45   :  { %370 = vmatpush3.bf16.msra.mxu0 %v416_v5  ;;  %390 = vmatpush3.bf16.msra.mxu1 %v425_v10 }
  0x46   :  { %371 = vmatprep.subr.bf16.mxu0 %v529_v0  ;;  %391 = vmatprep.subr.bf16.mxu1 %v529_v0 }
  0x49   :  { %372 = vmatpush3.bf16.msra.mxu0 %v417_v7  ;;  %392 = vmatpush3.bf16.msra.mxu1 %v426_v12 }
  0x4a   :  { %373 = vmatprep.subr.bf16.mxu0 %v529_v0  ;;  %393 = vmatprep.subr.bf16.mxu1 %v529_v0 }
  0x4d   :  { %374 = vmatpush3.bf16.msra.mxu0 %v418_v9  ;;  %394 = vmatpush3.bf16.msra.mxu1 %v427_v14 }
  0x4e   :  { %375 = vmatprep.subr.bf16.mxu0 %v529_v0  ;;  %395 = vmatprep.subr.bf16.mxu1 %v529_v0 }
  0x51   :  { %376 = vmatpush3.bf16.msra.mxu0 %v419_v11  ;;  %396 = vmatpush3.bf16.msra.mxu1 %v428_v16 }
  0x52   :  { %377 = vmatprep.subr.bf16.mxu0 %v529_v0  ;;  %397 = vmatprep.subr.bf16.mxu1 %v529_v0 }
  0x55   :  { %378 = vmatpush3.bf16.msra.mxu0 %v420_v13  ;;  %398 = vmatpush3.bf16.msra.mxu1 %v429_v17 }
  0x58   :  { %380 = vmatmul.mubr.bf16.vlgmr.msra.gmra.mrb[0].mxu0 %v421_v15 }
 0x12b   :  { %v172_v18 = vpop.f32.mrb[0].mxu0 }
 0x12c   :  { %v381_v19 = vpop.f32.mrb[1].mxu0 }
 0x12d   :  { %v175_v20 = vpop.f32.mrb[2].mxu0 }
 0x12e   :  { %v179_v21 = vpack.c.bf16 %v175_v20, %v172_v18  ;;  %v382_v22 = vpop.f32.mrb[3].mxu0 }
 0x130   :  { %400 = vmatmul.mubr.bf16.vlgmr.msra.gmra.mrb[0].mxu1 %v179_v21 }
 0x203   :  { %v280_v24 = vpop.f32.mrb[0].mxu1 }
 0x204   :  { %v303_v25 = vadd.f32 %v344_v23, %v280_v24  ;;  %v401_v26 = vpop.f32.mrb[1].mxu1 }
 0x205   :  { %v283_v27 = vpop.f32.mrb[2].mxu1 }
 0x206   :  { %v305_v28 = vmul.f32 4.0, %v303_v25  ;;  %v304_v29 = vadd.f32 %v344_v23, %v283_v27  ;;  %v402_v30 = vpop.f32.mrb[3].mxu1 }
 0x208   :  { %307 = vst [vmem:[#allocation9] sm:$0xff] %v305_v28  ;;  %v306_v31 = vmul.f32 4.0, %v304_v29 }
 0x20a   :  { %308 = vst [vmem:[#allocation9 + $0x8] sm:$0xff] %v306_v31 }
 0x20b   :  { %507 = shalt.err (!%p504_p0)
}
 0x20c   :  { %s508_s30 = scalar_lea.hbm %s630_s4, 256 }
 0x20d   :  { %p509_p1 = scmp.ne.s32.totalorder %s630_s4, %s508_s30  ;;  %p512_p2 = scmp.lt.u32.totalorder %s508_s30, %s630_s4 }
 0x20f   :  { %p514_p3 = pnand %p512_p2, %p509_p1 }
 0x211   :  { %517 = shalt.err (!%p514_p3)
}
 0x212   :  { %s532_s9 = smov 128   ;;  %s533_s10 = smov 8  }
 0x213   :  { %320 = dma.vmem_to_hbm [thread:$0]  %s315_s27, 256, %s630_s4, [#allocation5], %s532_s9, %s532_s9, %s533_s10  }
 0x214   :  { %522 = dma.done.wait [#allocation5], 256  }
 0x215   :  { %523 = vsyncadd [#allocation5], 4294967040 }
 0x216   :  { %324 = vsyncpa [#allocation4], 1 }
 0x217   :  { %325 = vsyncpa [#allocation7], 1 }
 0x218   :  { %326 = vsyncpa [#allocation5], 1 }

</bundles_post_ra>
